<compile_context>
chip_gen: v5e
topology: v5e:2x2
jax: 0.10.0
libtpu: 0.0.40
codegen_flags: <defaults>
</compile_context>

<pallas_src>
import functools

import jax
import jax.numpy as jnp
from jax import lax
from jax.experimental import pallas as pl
from jax.experimental.pallas import tpu as pltpu

_SQRT_HALF = 0.7071067811865476  # 1/sqrt(2)


def _erf_poly(x):
    """Abramowitz & Stegun 7.1.26 erf approximation, max abs error ~1.5e-7."""
    a1 = 0.254829592
    a2 = -0.284496736
    a3 = 1.421413741
    a4 = -1.453152027
    a5 = 1.061405429
    p = 0.3275911
    z = jnp.abs(x)
    t = 1.0 / (1.0 + p * z)
    poly = ((((a5 * t + a4) * t + a3) * t + a2) * t + a1) * t
    y = 1.0 - poly * jnp.exp(-z * z)
    return jnp.where(x >= 0.0, y, -y)


def _gelu_exact(x):
    """Exact (erf-based) GELU, matching torch.nn.GELU() default."""
    return 0.5 * x * (1.0 + _erf_poly(x * _SQRT_HALF))


def _mlp_kernel(x_ref, w1_ref, b1_ref, w2_ref, b2_ref, o_ref):
    # x_ref:  (tm, in)      row tile
    # w1_ref: (in, hidden)  fc1 weight, pre-transposed (resident across grid steps)
    # b1_ref: (1, hidden)
    # w2_ref: (hidden, out) fc2 weight, pre-transposed (resident across grid steps)
    # b2_ref: (1, out)
    # o_ref:  (tm, out)
    x = x_ref[...]

    # fc1 on the MXU with f32 accumulation, bias fused into the epilogue.
    h = jnp.dot(x, w1_ref[...], preferred_element_type=jnp.float32)
    h = _gelu_exact(h + b1_ref[...])

    # fc2 on the MXU with f32 accumulation, bias fused into the epilogue.
    h = h.astype(w2_ref.dtype)
    y = jnp.dot(h, w2_ref[...], preferred_element_type=jnp.float32)
    y = y + b2_ref[...]

    o_ref[...] = y.astype(o_ref.dtype)


def mlp_forward(x, w1, b1, w2, b2, *, block_m=512):
    """Fused MLP forward.

    x:  (..., in_features)
    w1: (hidden_features, in_features)   -- torch fc1.weight layout
    b1: (hidden_features,)
    w2: (out_features, hidden_features)  -- torch fc2.weight layout
    b2: (out_features,)
    Returns (..., out_features).
    """
    orig_shape = x.shape
    in_features = orig_shape[-1]
    hidden_features, in_f = w1.shape
    out_features, hid_f = w2.shape
    assert in_f == in_features and hid_f == hidden_features

    # Flatten all leading dims into one "rows" axis M = batch * seq.
    M = 1
    for d in orig_shape[:-1]:
        M *= d
    x2 = x.reshape(M, in_features)

    # Pre-transpose weights once in the wrapper so the kernel does plain
    # row-major (M,K)@(K,N) matmuls (no in-kernel transposes).
    w1t = jnp.asarray(w1).T.astype(x.dtype)            # (in, hidden)
    w2t = jnp.asarray(w2).T.astype(x.dtype)            # (hidden, out)
    b1r = jnp.asarray(b1).reshape(1, hidden_features).astype(jnp.float32)
    b2r = jnp.asarray(b2).reshape(1, out_features).astype(jnp.float32)

    # Row tile: biggest tile that keeps VMEM modest; ragged last tile is handled
    # by Pallas masking (no cross-row reductions, so padding rows are harmless).
    tm = M if M <= block_m else block_m
    grid = (pl.cdiv(M, tm),)

    out2 = pl.pallas_call(
        _mlp_kernel,
        out_shape=jax.ShapeDtypeStruct((M, out_features), x.dtype),
        grid_spec=pltpu.PrefetchScalarGridSpec(
            num_scalar_prefetch=0,
            grid=grid,
            in_specs=[
                pl.BlockSpec((tm, in_features), lambda i: (i, 0)),            # x tile
                pl.BlockSpec((in_features, hidden_features), lambda i: (0, 0)),  # W1^T (resident)
                pl.BlockSpec((1, hidden_features), lambda i: (0, 0)),         # b1  (resident)
                pl.BlockSpec((hidden_features, out_features), lambda i: (0, 0)),  # W2^T (resident)
                pl.BlockSpec((1, out_features), lambda i: (0, 0)),            # b2  (resident)
            ],
            out_specs=pl.BlockSpec((tm, out_features), lambda i: (i, 0)),
        ),
        compiler_params=pltpu.CompilerParams(
            # Row-tile axis is independent -> shard across TensorCores on v7x.
            dimension_semantics=("parallel",),
        ),
    )(x2, w1t, b1r, w2t, b2r)

    return out2.reshape(*orig_shape[:-1], out_features)


def mlp_ref(x, w1, b1, w2, b2):
    """Pure-JAX reference with true erf-based GELU (torch.nn.GELU default)."""
    xf = x.astype(jnp.float32)
    h = jnp.dot(xf, w1.astype(jnp.float32).T) + b1.astype(jnp.float32)
    h = 0.5 * h * (1.0 + lax.erf(h * _SQRT_HALF))
    y = jnp.dot(h, w2.astype(jnp.float32).T) + b2.astype(jnp.float32)
    return y.astype(x.dtype)


if __name__ == "__main__":
    # Small shapes consistent with the module: batch=2, seq=8,
    # in_features=32, hidden_features=64, out_features=32 (defaults to in).
    B, L, IN, HID = 2, 8, 32, 64
    OUT = IN

    key = jax.random.PRNGKey(0)
    kx, kw1, kb1, kw2, kb2 = jax.random.split(key, 5)

    x = jax.random.normal(kx, (B, L, IN), dtype=jnp.float32)
    # Torch-layout parameters (out_features, in_features), roughly torch-like init scale.
    w1 = jax.random.normal(kw1, (HID, IN), dtype=jnp.float32) * (1.0 / (IN ** 0.5))
    b1 = 0.1 * jax.random.normal(kb1, (HID,), dtype=jnp.float32)
    w2 = jax.random.normal(kw2, (OUT, HID), dtype=jnp.float32) * (1.0 / (HID ** 0.5))
    b2 = 0.1 * jax.random.normal(kb2, (OUT,), dtype=jnp.float32)

    out = mlp_forward(x, w1, b1, w2, b2)
    out = jax.block_until_ready(out)

    ref = mlp_ref(x, w1, b1, w2, b2)
    assert out.shape == (B, L, OUT)
    assert jnp.allclose(out, ref, atol=1e-4, rtol=1e-4), "mismatch vs reference"

    print("KERNEL_OK")
</pallas_src>

<mosaic_0001>
module attributes {stable_mosaic.version = 11 : i64} {
  func.func @_mlp_kernel(%arg0: i32, %arg1: memref<16x32xf32, #tpu.memory_space<vmem>>, %arg2: memref<32x64xf32, #tpu.memory_space<vmem>>, %arg3: memref<1x64xf32, #tpu.memory_space<vmem>>, %arg4: memref<64x32xf32, #tpu.memory_space<vmem>>, %arg5: memref<1x32xf32, #tpu.memory_space<vmem>>, %arg6: memref<16x32xf32, #tpu.memory_space<vmem>>) attributes {dimension_semantics = [#tpu.dimension_semantics<parallel>], iteration_bounds = array<i64: 1>, scalar_prefetch = 0 : i64, scratch_operands = 0 : i64, tpu.core_type = #tpu.core_type<tc>, window_params = [{transform_indices = @transform_0, window_bounds = array<i64: 16, 32>}, {pipeline_mode = #tpu.pipeline_mode<synchronous>, transform_indices = @transform_1, window_bounds = array<i64: 32, 64>}, {pipeline_mode = #tpu.pipeline_mode<synchronous>, transform_indices = @transform_2, window_bounds = array<i64: 1, 64>}, {pipeline_mode = #tpu.pipeline_mode<synchronous>, transform_indices = @transform_3, window_bounds = array<i64: 64, 32>}, {pipeline_mode = #tpu.pipeline_mode<synchronous>, transform_indices = @transform_4, window_bounds = array<i64: 1, 32>}, {transform_indices = @transform_5, window_bounds = array<i64: 16, 32>}]} {
    %c0 = arith.constant 0 : index
    %c0_0 = arith.constant 0 : index
    %0 = vector.load %arg1[%c0, %c0_0] : memref<16x32xf32, #tpu.memory_space<vmem>>, vector<16x32xf32>
    %c0_1 = arith.constant 0 : index
    %c0_2 = arith.constant 0 : index
    %1 = vector.load %arg2[%c0_1, %c0_2] : memref<32x64xf32, #tpu.memory_space<vmem>>, vector<32x64xf32>
    %cst = arith.constant dense<0.000000e+00> : vector<16x64xf32>
    %2 = tpu.matmul %0, %1, %cst {dimension_numbers = #tpu.dot_dimension_numbers<[1], [0], [0], [1], [0, 0, 1, 1], [], []>} : vector<16x32xf32>, vector<32x64xf32>, vector<16x64xf32> -> vector<16x64xf32>
    %c0_3 = arith.constant 0 : index
    %c0_4 = arith.constant 0 : index
    %3 = vector.load %arg3[%c0_3, %c0_4] : memref<1x64xf32, #tpu.memory_space<vmem>>, vector<1x64xf32>
    %4 = vector.broadcast %3 : vector<1x64xf32> to vector<16x64xf32>
    %5 = arith.addf %2, %4 : vector<16x64xf32>
    %cst_5 = arith.constant 5.000000e-01 : f32
    %6 = vector.broadcast %cst_5 : f32 to vector<16x64xf32>
    %7 = arith.mulf %6, %5 : vector<16x64xf32>
    %cst_6 = arith.constant 0.707106769 : f32
    %8 = vector.broadcast %cst_6 : f32 to vector<16x64xf32>
    %9 = arith.mulf %5, %8 : vector<16x64xf32>
    %10 = math.absf %9 : vector<16x64xf32>
    %cst_7 = arith.constant 0.327591091 : f32
    %11 = vector.broadcast %cst_7 : f32 to vector<16x64xf32>
    %12 = arith.mulf %11, %10 : vector<16x64xf32>
    %cst_8 = arith.constant 1.000000e+00 : f32
    %13 = vector.broadcast %cst_8 : f32 to vector<16x64xf32>
    %14 = arith.addf %13, %12 : vector<16x64xf32>
    %cst_9 = arith.constant 1.000000e+00 : f32
    %15 = vector.broadcast %cst_9 : f32 to vector<16x64xf32>
    %16 = arith.divf %15, %14 : vector<16x64xf32>
    %cst_10 = arith.constant 1.06140542 : f32
    %17 = vector.broadcast %cst_10 : f32 to vector<16x64xf32>
    %18 = arith.mulf %17, %16 : vector<16x64xf32>
    %cst_11 = arith.constant -1.45315206 : f32
    %19 = vector.broadcast %cst_11 : f32 to vector<16x64xf32>
    %20 = arith.addf %18, %19 : vector<16x64xf32>
    %21 = arith.mulf %20, %16 : vector<16x64xf32>
    %cst_12 = arith.constant 1.42141378 : f32
    %22 = vector.broadcast %cst_12 : f32 to vector<16x64xf32>
    %23 = arith.addf %21, %22 : vector<16x64xf32>
    %24 = arith.mulf %23, %16 : vector<16x64xf32>
    %cst_13 = arith.constant -0.284496725 : f32
    %25 = vector.broadcast %cst_13 : f32 to vector<16x64xf32>
    %26 = arith.addf %24, %25 : vector<16x64xf32>
    %27 = arith.mulf %26, %16 : vector<16x64xf32>
    %cst_14 = arith.constant 0.254829586 : f32
    %28 = vector.broadcast %cst_14 : f32 to vector<16x64xf32>
    %29 = arith.addf %27, %28 : vector<16x64xf32>
    %30 = arith.mulf %29, %16 : vector<16x64xf32>
    %cst_15 = arith.constant 0.000000e+00 : f32
    %31 = vector.broadcast %cst_15 : f32 to vector<16x64xf32>
    %32 = arith.subf %31, %10 : vector<16x64xf32>
    %33 = arith.mulf %32, %10 : vector<16x64xf32>
    %34 = math.exp %33 : vector<16x64xf32>
    %35 = arith.mulf %30, %34 : vector<16x64xf32>
    %cst_16 = arith.constant 1.000000e+00 : f32
    %36 = vector.broadcast %cst_16 : f32 to vector<16x64xf32>
    %37 = arith.subf %36, %35 : vector<16x64xf32>
    %cst_17 = arith.constant 0.000000e+00 : f32
    %38 = vector.broadcast %cst_17 : f32 to vector<16x64xf32>
    %39 = arith.cmpf oge, %9, %38 : vector<16x64xf32>
    %cst_18 = arith.constant 0.000000e+00 : f32
    %40 = vector.broadcast %cst_18 : f32 to vector<16x64xf32>
    %41 = arith.subf %40, %37 : vector<16x64xf32>
    %42 = arith.select %39, %37, %41 : vector<16x64xi1>, vector<16x64xf32>
    %cst_19 = arith.constant 1.000000e+00 : f32
    %43 = vector.broadcast %cst_19 : f32 to vector<16x64xf32>
    %44 = arith.addf %43, %42 : vector<16x64xf32>
    %45 = arith.mulf %7, %44 : vector<16x64xf32>
    %c0_20 = arith.constant 0 : index
    %c0_21 = arith.constant 0 : index
    %46 = vector.load %arg4[%c0_20, %c0_21] : memref<64x32xf32, #tpu.memory_space<vmem>>, vector<64x32xf32>
    %cst_22 = arith.constant dense<0.000000e+00> : vector<16x32xf32>
    %47 = tpu.matmul %45, %46, %cst_22 {dimension_numbers = #tpu.dot_dimension_numbers<[1], [0], [0], [1], [0, 0, 1, 1], [], []>} : vector<16x64xf32>, vector<64x32xf32>, vector<16x32xf32> -> vector<16x32xf32>
    %c0_23 = arith.constant 0 : index
    %c0_24 = arith.constant 0 : index
    %48 = vector.load %arg5[%c0_23, %c0_24] : memref<1x32xf32, #tpu.memory_space<vmem>>, vector<1x32xf32>
    %49 = vector.broadcast %48 : vector<1x32xf32> to vector<16x32xf32>
    %50 = arith.addf %47, %49 : vector<16x32xf32>
    %c0_25 = arith.constant 0 : index
    %c0_26 = arith.constant 0 : index
    %51 = vector.load %arg6[%c0_25, %c0_26] : memref<16x32xf32, #tpu.memory_space<vmem>>, vector<16x32xf32>
    tpu.vector_store %arg6[%c0_25, %c0_26], %50 {strides = array<i32>} : memref<16x32xf32, #tpu.memory_space<vmem>>, vector<16x32xf32>,
    return
  }
  func.func @transform_0(%arg0: i32) -> (i32, i32) {
    %c0_i32 = arith.constant 0 : i32
    %c0_i32_0 = arith.constant 0 : i32
    return %arg0, %c0_i32 : i32, i32
  }
  func.func @transform_1(%arg0: i32) -> (i32, i32) {
    %c0_i32 = arith.constant 0 : i32
    %c0_i32_0 = arith.constant 0 : i32
    %c0_i32_1 = arith.constant 0 : i32
    return %c0_i32, %c0_i32_0 : i32, i32
  }
  func.func @transform_2(%arg0: i32) -> (i32, i32) {
    %c0_i32 = arith.constant 0 : i32
    %c0_i32_0 = arith.constant 0 : i32
    %c0_i32_1 = arith.constant 0 : i32
    return %c0_i32, %c0_i32_0 : i32, i32
  }
  func.func @transform_3(%arg0: i32) -> (i32, i32) {
    %c0_i32 = arith.constant 0 : i32
    %c0_i32_0 = arith.constant 0 : i32
    %c0_i32_1 = arith.constant 0 : i32
    return %c0_i32, %c0_i32_0 : i32, i32
  }
  func.func @transform_4(%arg0: i32) -> (i32, i32) {
    %c0_i32 = arith.constant 0 : i32
    %c0_i32_0 = arith.constant 0 : i32
    %c0_i32_1 = arith.constant 0 : i32
    return %c0_i32, %c0_i32_0 : i32, i32
  }
  func.func @transform_5(%arg0: i32) -> (i32, i32) {
    %c0_i32 = arith.constant 0 : i32
    %c0_i32_0 = arith.constant 0 : i32
    return %arg0, %c0_i32 : i32, i32
  }
}

</mosaic_0001>

<bundles_post_ra>
// kernel: tpu_custom_call.1
= control target key start
LH: loop header
LB: loop body
LE: loop exit
PB: predicated region body
PF: predicated region fallthrough
CT: control target
= control target key end

     0   :  { %s362_s0 = inlined_call_operand.vmem [shape: f32[16,32], index: 0, kind: input, shape index: {}]   ;;  %s363_s1 = inlined_call_operand.vmem [shape: f32[32,64], index: 1, kind: input, shape index: {}]   ;;  %s364_s2 = inlined_call_operand.vmem [shape: f32[1,64], index: 2, kind: input, shape index: {}]   ;;  %s365_s3 = inlined_call_operand.vmem [shape: f32[64,32], index: 3, kind: input, shape index: {}]   ;;  %s366_s4 = inlined_call_operand.vmem [shape: f32[1,32], index: 4, kind: input, shape index: {}]   ;;  %s367_s5 = inlined_call_operand.hbm [shape: f32[16,32], index: 5, kind: output, shape index: {}]  }
   0x1   :  { %v26_v0 = vld [vmem:[%s363_s1 + $0x18] sm:$0xff]  ;;  %v25_v1 = vld [vmem:[%s363_s1 + $0x10] sm:$0xff]  ;;  %v24_v2 = vld [vmem:[%s363_s1 + $0x8] sm:$0xff] }
   0x2   :  { %50 = vmatpush.msra.mxu0 %v26_v0  ;;  %207 = vmatpush.msra.mxu3 %v26_v0 }
   0x4   :  { %51 = vmatpush.msra.mxu0 %v25_v1  ;;  %208 = vmatpush.msra.mxu3 %v25_v1 }
   0x5   :  { %10 = vsyncpa [#allocation3], 0  ;;  %v23_v3 = vld [vmem:[%s363_s1] sm:$0xff]  ;;  %vm31_vm0 = vcmask 261120   ;;  %v22_v5 = vld [vmem:[%s362_s0 + $0x8] sm:$0xff]  ;;  %vm153_vm10 = vcmask 523264  }
   0x6   :  { %52 = vmatpush.msra.mxu0 %v24_v2  ;;  %209 = vmatpush.msra.mxu3 %v24_v2  ;;  %v21_v4 = vld [vmem:[%s362_s0] sm:$0xff]  ;;  %v148_v7 = vld [vmem:[%s365_s3 + $0x38] sm:$0xff]  ;;  %v147_v8 = vld [vmem:[%s365_s3 + $0x30] sm:$0xff]  ;;  %s258_s21 = smov [#allocation2]   ;;  %s191_s25 = sshll.u32 %s367_s5, 4  ;;  %s192_s25 = int_to_ptr.hbm [resolvable:$true] %s191_s25 }
   0x7   :  { %v222_v6 = vld [vmem:[%s364_s2] ss:$0 sm:$0xff]  ;;  %168 = vmatpush.msra.mxu1 %v148_v7  ;;  %211 = vmatpush.msra.mxu2 %v148_v7  ;;  %v146_v9 = vld [vmem:[%s365_s3 + $0x28] sm:$0xff]  ;;  %v144_v14 = vld [vmem:[%s365_s3 + $0x18] sm:$0xff]  ;;  %s189_s22 = sshll.u32 %s258_s21, 4  ;;  %s259_s26 = smov 128   ;;  %s190_s22 = int_to_ptr.vmem [resolvable:$true] %s189_s22 }
   0x8   :  { %53 = vmatpush.msra.mxu0 %v23_v3  ;;  %210 = vmatpush.msra.mxu3 %v23_v3  ;;  %v145_v12 = vld [vmem:[%s365_s3 + $0x20] sm:$0xff]  ;;  %v143_v16 = vld [vmem:[%s365_s3 + $0x10] sm:$0xff]  ;;  %v142_v20 = vld [vmem:[%s365_s3 + $0x8] sm:$0xff]  ;;  %s260_s27 = smov 8  }
   0x9   :  { %203 = vmatmul.msk.f32.vlgmr.msra.gmra.mxu0 %vm31_vm0, %v21_v4  ;;  %204 = vmatmul.msk.f32.vlgmr.msra.gmra.mxu3 %vm31_vm0, %v22_v5  ;;  %v141_v23 = vld [vmem:[%s365_s3] sm:$0xff] }
   0xa   :  { %169 = vmatpush.msra.mxu1 %v147_v8  ;;  %212 = vmatpush.msra.mxu2 %v147_v8 }
   0xc   :  { %170 = vmatpush.msra.mxu1 %v146_v9  ;;  %213 = vmatpush.msra.mxu2 %v146_v9 }
   0xe   :  { %171 = vmatpush.msra.mxu1 %v145_v12  ;;  %214 = vmatpush.msra.mxu2 %v145_v12 }
  0x10   :  { %172 = vmatpush.msra.mxu1 %v144_v14  ;;  %215 = vmatpush.msra.mxu2 %v144_v14 }
  0x12   :  { %173 = vmatpush.msra.mxu1 %v143_v16  ;;  %216 = vmatpush.msra.mxu2 %v143_v16 }
  0x14   :  { %174 = vmatpush.msra.mxu1 %v142_v20  ;;  %217 = vmatpush.msra.mxu2 %v142_v20 }
  0x16   :  { %175 = vmatpush.msra.mxu1 %v141_v23  ;;  %218 = vmatpush.msra.mxu2 %v141_v23 }
  0x86   :  { %v55_v10 = vpop.f32.mrf.mxu0 }
  0x87   :  { %v323_v11 = vadd.f32 %v222_v6, %v55_v10 }
  0x89   :  { %v329_v13 = vmul.f32 0.70710677, %v323_v11 }
  0x8b   :  { %v65_v15 = vand.u32 2147483647, %v329_v13  ;;  %vm131_vm9 = vcmp.ge.f32.partialorder %v329_v13, 0.0  ;;  %v223_v13 = vld [vmem:[%s366_s4] ss:$0 sm:$0xff] }
  0x8c   :  { %v58_v17 = vpop.f32.mrf.mxu3 }
  0x8d   :  { %v67_v18 = vmul.f32 0.3275911, %v65_v15  ;;  %v338_v19 = vadd.f32 %v222_v6, %v58_v17  ;;  %v119_v38 = vsub.f32 0.0, %v65_v15 }
  0x8f   :  { %v69_v21 = vadd.f32 1.0, %v67_v18  ;;  %v344_v22 = vmul.f32 0.70710677, %v338_v19  ;;  %v121_v46 = vmul.f32 %v119_v38, %v65_v15  ;;  %v61_v15 = vmul.f32 0.5, %v323_v11 }
  0x91   :  { %224 = vrcp.f32 %v69_v21  ;;  %v66_v24 = vand.u32 2147483647, %v344_v22  ;;  %v82_v29 = vand.u32 2147483648, %v69_v21  ;;  %vm76_vm1 = vweird.f32 %v69_v21 }
  0x92   :  { %v80_v31 = vand.u32 2147483647, %v69_v21  ;;  %v123_v54 = vmul.f32 1.442695, %v121_v46  ;;  %vm132_vm11 = vcmp.ge.f32.partialorder %v344_v22, 0.0 }
  0x93   :  { %v68_v25 = vmul.f32 0.3275911, %v66_v24  ;;  %v83_v33 = vor.u32 1.1754944e-38, %v82_v29  ;;  %v120_v51 = vsub.f32 0.0, %v66_v24 }
  0x94   :  { %vm81_vm4 = vcmp.eq.f32.partialorder %v80_v31, 8.507059e+37 }
  0x95   :  { %v70_v26 = vadd.f32 1.0, %v68_v25  ;;  %v122_v58 = vmul.f32 %v120_v51, %v66_v24  ;;  %v62_v24 = vmul.f32 0.5, %v338_v19 }
  0x97   :  { %v225_v27 = vpop.eup %224  ;;  %226 = vrcp.f32 %v70_v26  ;;  %v97_v41 = vand.u32 2147483648, %v70_v26  ;;  %v95_v44 = vand.u32 2147483647, %v70_v26  ;;  %vm91_vm6 = vweird.f32 %v70_v26 }
  0x98   :  { %v72_v28 = vmul.f32 %v225_v27, %v69_v21  ;;  %vm77_vm2 = vweird.f32 %v225_v27  ;;  %228 = vpow2.f32 %v123_v54  ;;  %v125_v63 = vmul.f32 1.442695, %v122_v58 }
  0x99   :  { %vm78_vm3 = vmor %vm76_vm1, %vm77_vm2  ;;  %v98_v48 = vor.u32 1.1754944e-38, %v97_v41  ;;  %vm96_vm8 = vcmp.eq.f32.partialorder %v95_v44, 8.507059e+37 }
  0x9a   :  { %v73_v30 = vsub.f32 1.0, %v72_v28  ;;  %230 = vpow2.f32 %v125_v63 }
  0x9c   :  { %v74_v32 = vmul.f32 %v225_v27, %v73_v30 }
  0x9d   :  { %v227_v34 = vpop.eup %226 }
  0x9e   :  { %v75_v35 = vadd.f32 %v225_v27, %v74_v32  ;;  %v87_v36 = vmul.f32 %v227_v34, %v70_v26  ;;  %vm92_vm5 = vweird.f32 %v227_v34  ;;  %v229_v3 = vpop.eup %228 }
  0x9f   :  { %vm93_vm7 = vmor %vm91_vm6, %vm92_vm5 }
  0xa0   :  { %v79_v37 = vsel %vm78_vm3, %v225_v27, %v75_v35  ;;  %v88_v39 = vsub.f32 1.0, %v87_v36  ;;  %v231_v12 = vpop.eup %230 }
  0xa1   :  { %v84_v40 = vsel %vm81_vm4, %v83_v33, %v79_v37 }
  0xa2   :  { %v101_v42 = vmul.f32 1.0614054, %v84_v40  ;;  %v89_v43 = vmul.f32 %v227_v34, %v88_v39 }
  0xa4   :  { %v103_v45 = vadd.f32 -1.4531521, %v101_v42  ;;  %v90_v47 = vadd.f32 %v227_v34, %v89_v43 }
  0xa6   :  { %v105_v49 = vmul.f32 %v103_v45, %v84_v40  ;;  %v94_v50 = vsel %vm93_vm7, %v227_v34, %v90_v47 }
  0xa7   :  { %v99_v53 = vsel %vm96_vm8, %v98_v48, %v94_v50 }
  0xa8   :  { %v107_v52 = vadd.f32 1.4214138, %v105_v49  ;;  %v102_v55 = vmul.f32 1.0614054, %v99_v53 }
  0xaa   :  { %v109_v56 = vmul.f32 %v107_v52, %v84_v40  ;;  %v104_v57 = vadd.f32 -1.4531521, %v102_v55 }
  0xac   :  { %v111_v59 = vadd.f32 -0.28449672, %v109_v56  ;;  %v106_v60 = vmul.f32 %v104_v57, %v99_v53 }
  0xae   :  { %v113_v61 = vmul.f32 %v111_v59, %v84_v40  ;;  %v108_v62 = vadd.f32 1.4214138, %v106_v60 }
  0xb0   :  { %v115_v0 = vadd.f32 0.2548296, %v113_v61  ;;  %v110_v1 = vmul.f32 %v108_v62, %v99_v53 }
  0xb2   :  { %v117_v2 = vmul.f32 %v115_v0, %v84_v40  ;;  %v112_v4 = vadd.f32 -0.28449672, %v110_v1 }
  0xb4   :  { %v127_v5 = vmul.f32 %v229_v3, %v117_v2  ;;  %v114_v6 = vmul.f32 %v112_v4, %v99_v53 }
  0xb6   :  { %v129_v7 = vsub.f32 1.0, %v127_v5  ;;  %v116_v8 = vadd.f32 0.2548296, %v114_v6 }
  0xb8   :  { %v133_v9 = vsub.f32 0.0, %v129_v7  ;;  %v118_v10 = vmul.f32 %v116_v8, %v99_v53 }
  0xba   :  { %v135_v14 = vsel %vm131_vm9, %v129_v7, %v133_v9  ;;  %v128_v17 = vmul.f32 %v231_v12, %v118_v10 }
  0xbb   :  { %v137_v16 = vadd.f32 1.0, %v135_v14 }
  0xbc   :  { %v130_v20 = vsub.f32 1.0, %v128_v17 }
  0xbd   :  { %v139_v18 = vmul.f32 %v137_v16, %v61_v15 }
  0xbe   :  { %v134_v21 = vsub.f32 0.0, %v130_v20 }
  0xbf   :  { %205 = vmatmul.msk.f32.vlgmr.msra.gmra.mxu1 %vm153_vm10, %v139_v18 }
  0xc0   :  { %v136_v23 = vsel %vm132_vm11, %v130_v20, %v134_v21 }
  0xc1   :  { %v138_v25 = vadd.f32 1.0, %v136_v23 }
  0xc3   :  { %v140_v26 = vmul.f32 %v138_v25, %v62_v24 }
  0xc5   :  { %206 = vmatmul.msk.f32.vlgmr.msra.gmra.mxu2 %vm153_vm10, %v140_v26 }
 0x13c   :  { %v177_v11 = vpop.f32.mrf.mxu1 }
 0x13d   :  { %v178_v27 = vadd.f32 %v223_v13, %v177_v11 }
 0x13f   :  { %183 = vst.msk [vmem:[#allocation2] sm:$0xff] %vm31_vm0, %v178_v27 }
 0x148   :  { %v180_v22 = vpop.f32.mrf.mxu2 }
 0x149   :  { %v181_v19 = vadd.f32 %v223_v13, %v180_v22 }
 0x14b   :  { %184 = vst.msk [vmem:[#allocation2 + $0x8] sm:$0xff] %vm31_vm0, %v181_v19 }
 0x14c   :  { %197 = dma.vmem_to_hbm [thread:$0]  %s190_s22, 256, %s192_s25, [#allocation3], %s259_s26, %s259_s26, %s260_s27  }
 0x14d   :  { %256 = dma.done.wait [#allocation3], 256  }
 0x14e   :  { %257 = vsyncadd [#allocation3], 4294967040 }
 0x14f   :  { %202 = vsyncpa [#allocation3], 1 }

</bundles_post_ra>
